<compile_context>
chip_gen: v5e
topology: v5e:2x2
jax: 0.10.0
libtpu: 0.0.40
codegen_flags: <defaults>
</compile_context>

<pallas_src>
import functools

import jax
import jax.numpy as jnp
from jax.experimental import pallas as pl
from jax.experimental.pallas import tpu as pltpu

HIDDEN = 50  # hard-coded hidden width of the Encoder MLP


def _round_up(n, m):
    return ((n + m - 1) // m) * m


def encoder_kernel(x_ref, w1_ref, b1_ref, w2_ref, b2_ref, o_ref):
    """Fused MLP tile: (x @ W1 + b1) -> ReLU -> (h @ W2 + b2).

    x_ref:  (TB, input_dim)        -- streamed per grid step
    w1_ref: (input_dim, H_PAD)     -- resident (constant index_map)
    b1_ref: (1, H_PAD)             -- resident
    w2_ref: (H_PAD, latent_dim)    -- resident, padded only on hidden dim
    b2_ref: (1, latent_dim)        -- resident, true width
    o_ref:  (TB, latent_dim)       -- true-width output tile
    """
    x = x_ref[...].astype(jnp.float32)          # (TB, K)
    w1 = w1_ref[...]                            # (K, H_PAD)
    tb = x.shape[0]
    k_dim = x.shape[1]
    h_pad = w1.shape[1]

    if k_dim <= 8:
        # Tiny contraction (e.g. K=2: AMT, WT): compute on the VPU instead of
        # pushing a nearly-empty matmul through the MXU.  Static unroll, with
        # the bias broadcast hoisted outside the (unrolled) loop.
        h = jnp.broadcast_to(b1_ref[...], (tb, h_pad))
        for k in range(k_dim):
            h = h + x[:, k:k + 1] * w1[k:k + 1, :]
    else:
        h = jnp.dot(x, w1, preferred_element_type=jnp.float32) + b1_ref[...]

    h = jnp.maximum(h, 0.0)                     # ReLU (padded lanes stay 0)

    # Second layer: (TB, 128) @ (128, latent_dim) on the MXU, f32 accumulation.
    y = jnp.dot(h, w2_ref[...], preferred_element_type=jnp.float32)
    y = y + b2_ref[...]

    o_ref[...] = y.astype(o_ref.dtype)


def pad_encoder_params(w1, b1, w2, b2):
    """Pad weights once (outside the hot path).

    Hidden dim is zero-padded to a multiple of 128 so the second matmul is a
    full-lane MXU pass; zero padding is exact (padded hidden units are
    ReLU(0 + 0) = 0 and multiply zero rows of the padded W2)."""
    f32 = jnp.float32
    input_dim, hidden = w1.shape
    _, latent_dim = w2.shape
    h_pad = _round_up(hidden, 128)

    w1_p = jnp.zeros((input_dim, h_pad), f32).at[:, :hidden].set(w1.astype(f32))
    b1_p = jnp.zeros((1, h_pad), f32).at[:, :hidden].set(b1.astype(f32))
    w2_p = jnp.zeros((h_pad, latent_dim), f32).at[:hidden, :].set(w2.astype(f32))
    b2_p = b2.astype(f32).reshape(1, latent_dim)
    return w1_p, b1_p, w2_p, b2_p


@functools.partial(jax.jit, static_argnames=("block_rows",))
def encoder_forward(x, w1_p, b1_p, w2_p, b2_p, *, block_rows=4096):
    """x: (B, input_dim) float32 -> (B, latent_dim) float32.

    Takes the *padded* params from pad_encoder_params so no per-call padding
    work remains in the forward path."""
    B, input_dim = x.shape
    h_pad, latent_dim = w2_p.shape

    # Adaptive batch tile: multiple of 8, capped by block_rows, and split into
    # >= 2 grid steps when B allows so v7x's two TensorCores both get work
    # (no-op on single-TC v5e/v6e).
    b_pad8 = _round_up(max(B, 8), 8)
    tb = min(block_rows, b_pad8)
    if b_pad8 >= 16:
        tb = min(tb, _round_up((b_pad8 + 1) // 2, 8))
    tb = _round_up(max(tb, 8), 8)

    b_pad = _round_up(B, tb)
    x_p = x if b_pad == B else jnp.pad(x, ((0, b_pad - B), (0, 0)))

    grid = (b_pad // tb,)

    out = pl.pallas_call(
        encoder_kernel,
        out_shape=jax.ShapeDtypeStruct((b_pad, latent_dim), x.dtype),
        grid=grid,
        in_specs=[
            pl.BlockSpec((tb, input_dim), lambda i: (i, 0)),        # streamed x tile
            pl.BlockSpec((input_dim, h_pad), lambda i: (0, 0)),     # resident W1
            pl.BlockSpec((1, h_pad), lambda i: (0, 0)),             # resident b1
            pl.BlockSpec((h_pad, latent_dim), lambda i: (0, 0)),    # resident W2
            pl.BlockSpec((1, latent_dim), lambda i: (0, 0)),        # resident b2
        ],
        # True-width output block (last dim == full array dim -> legal); avoids
        # writing a 128-lane padded slab to HBM.
        out_specs=pl.BlockSpec((tb, latent_dim), lambda i: (i, 0)),
        compiler_params=pltpu.CompilerParams(
            dimension_semantics=("parallel",),   # batch tiles shard across TCs on v7x
            vmem_limit_bytes=32 * 1024 * 1024,   # explicit; safe on v5e's smaller default
        ),
    )(x_p, w1_p, b1_p, w2_p, b2_p)

    # Only a row trim remains (and only when B % tb != 0).
    return out if b_pad == B else out[:B]


def init_encoder_params(key, input_dim, latent_dim):
    """Deterministic init mirroring PyTorch nn.Linear defaults:
    U(-1/sqrt(fan_in), 1/sqrt(fan_in)) for both weight and bias."""
    k1, k2, k3, k4 = jax.random.split(key, 4)

    bound1 = 1.0 / jnp.sqrt(jnp.float32(input_dim))
    w1 = jax.random.uniform(k1, (input_dim, HIDDEN), jnp.float32, -bound1, bound1)
    b1 = jax.random.uniform(k2, (HIDDEN,), jnp.float32, -bound1, bound1)

    bound2 = 1.0 / jnp.sqrt(jnp.float32(HIDDEN))
    w2 = jax.random.uniform(k3, (HIDDEN, latent_dim), jnp.float32, -bound2, bound2)
    b2 = jax.random.uniform(k4, (latent_dim,), jnp.float32, -bound2, bound2)

    return w1, b1, w2, b2


def _reference(x, w1, b1, w2, b2):
    return jnp.maximum(x @ w1 + b1, 0.0) @ w2 + b2


if __name__ == "__main__":
    key = jax.random.PRNGKey(0)
    k_x1, k_x2, k_p = jax.random.split(key, 3)

    input_dim = 2     # (AMT, WT) initial features
    latent_dim = 16
    w1, b1, w2, b2 = init_encoder_params(k_p, input_dim, latent_dim)
    # Pad once, outside the per-call forward path.
    w1_p, b1_p, w2_p, b2_p = jax.block_until_ready(
        pad_encoder_params(w1, b1, w2, b2))

    # Check 1: small batch, single grid step, no row padding.
    x1 = jax.random.normal(k_x1, (8, input_dim), jnp.float32)
    out1 = jax.block_until_ready(encoder_forward(x1, w1_p, b1_p, w2_p, b2_p))
    ref1 = _reference(x1, w1, b1, w2, b2)
    assert out1.shape == (8, latent_dim)
    assert jnp.allclose(out1, ref1, atol=1e-5, rtol=1e-5)

    # Check 2: batch not a multiple of the tile -> exercises grid > 1 and the
    # row pad/trim path (37 rows, 16-row tiles -> grid of 3).
    x2 = jax.random.normal(k_x2, (37, input_dim), jnp.float32)
    out2 = jax.block_until_ready(
        encoder_forward(x2, w1_p, b1_p, w2_p, b2_p, block_rows=16))
    ref2 = _reference(x2, w1, b1, w2, b2)
    assert out2.shape == (37, latent_dim)
    assert jnp.allclose(out2, ref2, atol=1e-5, rtol=1e-5)

    print("KERNEL_OK")
</pallas_src>

<mosaic_0001>
module attributes {stable_mosaic.version = 11 : i64} {
  func.func @encoder_kernel(%arg0: i32, %arg1: memref<8x2xf32, #tpu.memory_space<vmem>>, %arg2: memref<2x128xf32, #tpu.memory_space<vmem>>, %arg3: memref<1x128xf32, #tpu.memory_space<vmem>>, %arg4: memref<128x16xf32, #tpu.memory_space<vmem>>, %arg5: memref<1x16xf32, #tpu.memory_space<vmem>>, %arg6: memref<8x16xf32, #tpu.memory_space<vmem>>) attributes {dimension_semantics = [#tpu.dimension_semantics<parallel>], iteration_bounds = array<i64: 1>, scalar_prefetch = 0 : i64, scratch_operands = 0 : i64, tpu.core_type = #tpu.core_type<tc>, window_params = [{transform_indices = @transform_0, window_bounds = array<i64: 8, 2>}, {pipeline_mode = #tpu.pipeline_mode<synchronous>, transform_indices = @transform_1, window_bounds = array<i64: 2, 128>}, {pipeline_mode = #tpu.pipeline_mode<synchronous>, transform_indices = @transform_2, window_bounds = array<i64: 1, 128>}, {pipeline_mode = #tpu.pipeline_mode<synchronous>, transform_indices = @transform_3, window_bounds = array<i64: 128, 16>}, {pipeline_mode = #tpu.pipeline_mode<synchronous>, transform_indices = @transform_4, window_bounds = array<i64: 1, 16>}, {transform_indices = @transform_5, window_bounds = array<i64: 8, 16>}]} {
    %c0 = arith.constant 0 : index
    %c0_0 = arith.constant 0 : index
    %0 = vector.load %arg1[%c0, %c0_0] : memref<8x2xf32, #tpu.memory_space<vmem>>, vector<8x2xf32>
    %c0_1 = arith.constant 0 : index
    %c0_2 = arith.constant 0 : index
    %1 = vector.load %arg2[%c0_1, %c0_2] : memref<2x128xf32, #tpu.memory_space<vmem>>, vector<2x128xf32>
    %c0_3 = arith.constant 0 : index
    %c0_4 = arith.constant 0 : index
    %2 = vector.load %arg3[%c0_3, %c0_4] : memref<1x128xf32, #tpu.memory_space<vmem>>, vector<1x128xf32>
    %3 = vector.shape_cast %2 : vector<1x128xf32> to vector<1x128xf32>
    %4 = vector.broadcast %3 : vector<1x128xf32> to vector<8x128xf32>
    %5 = vector.extract_strided_slice %0 {offsets = [0, 0], sizes = [8, 1], strides = [1, 1]} : vector<8x2xf32> to vector<8x1xf32>
    %6 = vector.extract_strided_slice %1 {offsets = [0, 0], sizes = [1, 128], strides = [1, 1]} : vector<2x128xf32> to vector<1x128xf32>
    %7 = vector.broadcast %5 : vector<8x1xf32> to vector<8x128xf32>
    %8 = vector.broadcast %6 : vector<1x128xf32> to vector<8x128xf32>
    %9 = arith.mulf %7, %8 : vector<8x128xf32>
    %10 = arith.addf %4, %9 : vector<8x128xf32>
    %11 = vector.extract_strided_slice %0 {offsets = [0, 1], sizes = [8, 1], strides = [1, 1]} : vector<8x2xf32> to vector<8x1xf32>
    %12 = vector.extract_strided_slice %1 {offsets = [1, 0], sizes = [1, 128], strides = [1, 1]} : vector<2x128xf32> to vector<1x128xf32>
    %13 = vector.broadcast %11 : vector<8x1xf32> to vector<8x128xf32>
    %14 = vector.broadcast %12 : vector<1x128xf32> to vector<8x128xf32>
    %15 = arith.mulf %13, %14 : vector<8x128xf32>
    %16 = arith.addf %10, %15 : vector<8x128xf32>
    %cst = arith.constant 0.000000e+00 : f32
    %17 = vector.broadcast %cst : f32 to vector<8x128xf32>
    %18 = arith.maximumf %16, %17 : vector<8x128xf32>
    %c0_5 = arith.constant 0 : index
    %c0_6 = arith.constant 0 : index
    %19 = vector.load %arg4[%c0_5, %c0_6] : memref<128x16xf32, #tpu.memory_space<vmem>>, vector<128x16xf32>
    %cst_7 = arith.constant dense<0.000000e+00> : vector<8x16xf32>
    %20 = tpu.matmul %18, %19, %cst_7 {dimension_numbers = #tpu.dot_dimension_numbers<[1], [0], [0], [1], [0, 0, 1, 1], [], []>} : vector<8x128xf32>, vector<128x16xf32>, vector<8x16xf32> -> vector<8x16xf32>
    %c0_8 = arith.constant 0 : index
    %c0_9 = arith.constant 0 : index
    %21 = vector.load %arg5[%c0_8, %c0_9] : memref<1x16xf32, #tpu.memory_space<vmem>>, vector<1x16xf32>
    %22 = vector.broadcast %21 : vector<1x16xf32> to vector<8x16xf32>
    %23 = arith.addf %20, %22 : vector<8x16xf32>
    %c0_10 = arith.constant 0 : index
    %c0_11 = arith.constant 0 : index
    %24 = vector.load %arg6[%c0_10, %c0_11] : memref<8x16xf32, #tpu.memory_space<vmem>>, vector<8x16xf32>
    tpu.vector_store %arg6[%c0_10, %c0_11], %23 {strides = array<i32>} : memref<8x16xf32, #tpu.memory_space<vmem>>, vector<8x16xf32>,
    return
  }
  func.func @transform_0(%arg0: i32) -> (i32, i32) {
    %c0_i32 = arith.constant 0 : i32
    %c0_i32_0 = arith.constant 0 : i32
    return %arg0, %c0_i32 : i32, i32
  }
  func.func @transform_1(%arg0: i32) -> (i32, i32) {
    %c0_i32 = arith.constant 0 : i32
    %c0_i32_0 = arith.constant 0 : i32
    %c0_i32_1 = arith.constant 0 : i32
    return %c0_i32, %c0_i32_0 : i32, i32
  }
  func.func @transform_2(%arg0: i32) -> (i32, i32) {
    %c0_i32 = arith.constant 0 : i32
    %c0_i32_0 = arith.constant 0 : i32
    %c0_i32_1 = arith.constant 0 : i32
    return %c0_i32, %c0_i32_0 : i32, i32
  }
  func.func @transform_3(%arg0: i32) -> (i32, i32) {
    %c0_i32 = arith.constant 0 : i32
    %c0_i32_0 = arith.constant 0 : i32
    %c0_i32_1 = arith.constant 0 : i32
    return %c0_i32, %c0_i32_0 : i32, i32
  }
  func.func @transform_4(%arg0: i32) -> (i32, i32) {
    %c0_i32 = arith.constant 0 : i32
    %c0_i32_0 = arith.constant 0 : i32
    %c0_i32_1 = arith.constant 0 : i32
    return %c0_i32, %c0_i32_0 : i32, i32
  }
  func.func @transform_5(%arg0: i32) -> (i32, i32) {
    %c0_i32 = arith.constant 0 : i32
    %c0_i32_0 = arith.constant 0 : i32
    return %arg0, %c0_i32 : i32, i32
  }
}

</mosaic_0001>

<bundles_post_ra>
// kernel: encoder_forward.1
= control target key start
LH: loop header
LB: loop body
LE: loop exit
PB: predicated region body
PF: predicated region fallthrough
CT: control target
= control target key end

     0   :  { %v134_v3 = vmov 0   ;;  %s230_s0 = inlined_call_operand.vmem [shape: f32[8,2], index: 0, kind: input, shape index: {}]   ;;  %s231_s1 = inlined_call_operand.vmem [shape: f32[2,128], index: 1, kind: input, shape index: {}]   ;;  %s232_s2 = inlined_call_operand.vmem [shape: f32[1,128], index: 2, kind: input, shape index: {}]   ;;  %s233_s3 = inlined_call_operand.vmem [shape: f32[128,16], index: 3, kind: input, shape index: {}]   ;;  %s234_s4 = inlined_call_operand.vmem [shape: f32[1,16], index: 4, kind: input, shape index: {}]   ;;  %s235_s5 = inlined_call_operand.hbm [shape: f32[8,16], index: 5, kind: output, shape index: {}]  }
   0x1   :  { %v21_v0 = vld [vmem:[%s230_s0] sm:$0xff]  ;;  %v58_v1 = vld [vmem:[%s233_s3 + $0x78] sm:$0xff]  ;;  %v57_v2 = vld [vmem:[%s233_s3 + $0x70] sm:$0xff]  ;;  %104 = vset.pattern.permute.xlu0 %v134_v3 }
   0x2   :  { %63 = vmatpush.msra.mxu0 %v58_v1  ;;  %29 = vperm.xlu0 %104, %v21_v0   ;;  %v56_v4 = vld [vmem:[%s233_s3 + $0x68] sm:$0xff]  ;;  %v55_v5 = vld [vmem:[%s233_s3 + $0x60] sm:$0xff] }
   0x4   :  { %64 = vmatpush.msra.mxu0 %v57_v2 }
   0x5   :  { %10 = vsyncpa [#allocation3], 0  ;;  %v54_v6 = vld [vmem:[%s233_s3 + $0x58] sm:$0xff]  ;;  %v53_v7 = vld [vmem:[%s233_s3 + $0x50] sm:$0xff]  ;;  %v135_v8 = vmov 1   ;;  %s136_s30 = smov [#allocation2]  }
   0x6   :  { %65 = vmatpush.msra.mxu0 %v56_v4  ;;  %v52_v9 = vld [vmem:[%s233_s3 + $0x48] sm:$0xff]  ;;  %v51_v10 = vld [vmem:[%s233_s3 + $0x40] sm:$0xff]  ;;  %v50_v11 = vld [vmem:[%s233_s3 + $0x38] sm:$0xff]  ;;  %s92_s8 = sshll.u32 %s235_s5, 4  ;;  %vm83_vm0 = vcmask 130048   ;;  %s93_s8 = int_to_ptr.hbm [resolvable:$true] %s92_s8 }
   0x7   :  { %v49_v12 = vld [vmem:[%s233_s3 + $0x30] sm:$0xff]  ;;  %v48_v13 = vld [vmem:[%s233_s3 + $0x28] sm:$0xff]  ;;  %v47_v14 = vld [vmem:[%s233_s3 + $0x20] sm:$0xff] }
   0x8   :  { %66 = vmatpush.msra.mxu0 %v55_v5  ;;  %v46_v15 = vld [vmem:[%s233_s3 + $0x18] sm:$0xff]  ;;  %v45_v16 = vld [vmem:[%s233_s3 + $0x10] sm:$0xff]  ;;  %v44_v17 = vld [vmem:[%s233_s3 + $0x8] sm:$0xff] }
   0x9   :  { %v43_v18 = vld [vmem:[%s233_s3] sm:$0xff] }
   0xa   :  { %67 = vmatpush.msra.mxu0 %v54_v6  ;;  %105 = vset.pattern.permute.xlu0 %v135_v8  ;;  %v22_v19 = vld [vmem:[%s231_s1] sm:$0x3]  ;;  %s90_s1 = sshll.u32 %s136_s30, 4  ;;  %s91_s1 = int_to_ptr.vmem [resolvable:$true] %s90_s1 }
   0xb   :  { %36 = vperm.xlu0 %105, %v21_v0   ;;  %v32_v21 = vperm.slane %v22_v19, 0  ;;  %v106_v22 = vld [vmem:[%s232_s2] ss:$0 sm:$0xff]  ;;  %v39_v24 = vperm.slane %v22_v19, 1 }
   0xc   :  { %68 = vmatpush.msra.mxu0 %v53_v7  ;;  %v107_v30 = vld [vmem:[%s234_s4] ss:$0 sm:$0xff] }
   0xe   :  { %69 = vmatpush.msra.mxu0 %v52_v9 }
  0x10   :  { %70 = vmatpush.msra.mxu0 %v51_v10 }
  0x12   :  { %71 = vmatpush.msra.mxu0 %v50_v11 }
  0x14   :  { %72 = vmatpush.msra.mxu0 %v49_v12 }
  0x16   :  { %73 = vmatpush.msra.mxu0 %v48_v13 }
  0x18   :  { %74 = vmatpush.msra.mxu0 %v47_v14 }
  0x1a   :  { %75 = vmatpush.msra.mxu0 %v46_v15 }
  0x1c   :  { %76 = vmatpush.msra.mxu0 %v45_v16 }
  0x1e   :  { %77 = vmatpush.msra.mxu0 %v44_v17 }
  0x20   :  { %78 = vmatpush.msra.mxu0 %v43_v18 }
  0x74   :  { %v30_v20 = vpop.permute.xlu0 %29 }
  0x75   :  { %v33_v23 = vmul.f32 %v32_v21, %v30_v20 }
  0x77   :  { %v34_v26 = vadd.f32 %v106_v22, %v33_v23 }
  0x7d   :  { %v37_v25 = vpop.permute.xlu0 %36 }
  0x7e   :  { %v40_v27 = vmul.f32 %v39_v24, %v37_v25 }
  0x80   :  { %v41_v28 = vadd.f32 %v40_v27, %v34_v26 }
  0x82   :  { %v42_v29 = vmax.f32 %v41_v28, 0.0 }
  0x84   :  { %79 = vmatmul.f32.vlgmr.msra.gmra.mxu0 %v42_v29 }
 0x101   :  { %v80_v31 = vpop.f32.mrf.mxu0 }
 0x102   :  { %v81_v32 = vadd.f32 %v107_v30, %v80_v31 }
 0x104   :  { %84 = vst.msk [vmem:[#allocation2] sm:$0xff] %vm83_vm0, %v81_v32 }
 0x105   :  { %95 = dma.vmem_to_hbm [thread:$0]  %s91_s1, 128, %s93_s8, [#allocation3]  }
 0x106   :  { %132 = dma.done.wait [#allocation3], 128  }
 0x107   :  { %133 = vsyncadd [#allocation3], 4294967168 }
 0x108   :  { %100 = vsyncpa [#allocation3], 1 }

</bundles_post_ra>
